<compile_context>
chip_gen: v6e
topology: v6e:2x2x1
jax: 0.10.0
libtpu: 0.0.40
codegen_flags: <defaults>
</compile_context>

<pallas_src>
import functools

import numpy as np
import jax
import jax.numpy as jnp
from jax.experimental import pallas as pl
from jax.experimental.pallas import tpu as pltpu

MATMUL_DTYPE = jnp.bfloat16     # conv matmul operands (f32 accumulation)
BN_EPS = 1e-5
KSIZE = 3

_COMPILER_PARAMS = pltpu.CompilerParams(
    dimension_semantics=("arbitrary",),       # single-step grid
    vmem_limit_bytes=32 * 1024 * 1024,        # working set << limit on v5e..v7x
)


# ------------------------------------------------------------------- kernel

def _down_block_kernel(x_ref, w1_ref, b1_ref, g1_ref, bt1_ref,
                       w2_ref, b2_ref, g2_ref, bt2_ref, p_ref, o_ref,
                       *, n, k, count):
    """Fully fused DownBlock forward over the whole batch.

    Layout: activations are lane-dense (rows, W*C); row = image*rows_per_img + h,
    lane = w*C + c.  Each conv is ONE K-merged band matmul (reflection pad along
    W is baked into the band weights); reflection pad along H duplicates two
    rows in registers.  BatchNorm uses batch statistics computed once per layer.
    """

    def conv_pad(x_flat, w_ref, b_ref):
        # x_flat: (n * h_in, wc_in) f32   ->   padded output (n * (ho+2), wc_out)
        rows_in = x_flat.shape[0] // n
        ho = rows_in - (k - 1)                    # valid-conv output rows/image
        # Batch-stacked, K-concatenated LHS: (n*ho, k*wc_in); cast once.
        lhs = jnp.concatenate(
            [jnp.concatenate(
                [x_flat[i * rows_in + kh: i * rows_in + kh + ho, :]
                 for kh in range(k)], axis=-1)
             for i in range(n)], axis=0).astype(MATMUL_DTYPE)
        acc = jnp.dot(lhs, w_ref[...],
                      preferred_element_type=jnp.float32) + b_ref[...]
        # ReflectionPad2d(1): H padding = duplicate conv rows 1 and ho-2,
        # assembled in registers so the eventual store is one aligned block.
        out_rows = []
        for i in range(n):
            ai = acc[i * ho:(i + 1) * ho, :]
            out_rows += [ai[1:2, :], ai, ai[ho - 2:ho - 1, :]]
        return jnp.concatenate(out_rows, axis=0)          # (n*(ho+2), wc_out)

    def bn_scale_shift(ypad, g_ref, bt_ref):
        # Batch statistics of the *padded* tensor, computed once per layer.
        s1 = jnp.sum(ypad, axis=0, keepdims=True)               # (1, wc)
        s2 = jnp.sum(ypad * ypad, axis=0, keepdims=True)        # (1, wc)
        inv_cnt = 1.0 / count
        # p_ref: lane->channel matching matrix.  One tiny f32 matmul per
        # statistic sums the W positions of each channel and broadcasts the
        # per-channel value back to every lane (keeps everything lane-flat).
        mean = jnp.dot(s1, p_ref[...], preferred_element_type=jnp.float32) * inv_cnt
        esq = jnp.dot(s2, p_ref[...], preferred_element_type=jnp.float32) * inv_cnt
        var = esq - mean * mean                  # biased var (train-mode BN)
        scale = jax.lax.rsqrt(var + BN_EPS) * g_ref[...]
        shift = bt_ref[...] - mean * scale
        return scale, shift

    # layer 1: conv1 + bias + reflect pad + BN1(batch stats) + ReLU
    y1 = conv_pad(x_ref[...], w1_ref, b1_ref)
    sc1, sh1 = bn_scale_shift(y1, g1_ref, bt1_ref)
    a1 = jnp.maximum(y1 * sc1 + sh1, 0.0)

    # layer 2: conv2 + bias + reflect pad + BN2(batch stats) + ReLU
    y2 = conv_pad(a1, w2_ref, b2_ref)
    sc2, sh2 = bn_scale_shift(y2, g2_ref, bt2_ref)
    o_ref[...] = jnp.maximum(y2 * sc2 + sh2, 0.0)     # single full-block store


# --------------------------------------------------------- pallas_call glue

def _down_block_call(x2, w1, b1, g1, bt1, w2, b2, g2, bt2, pmat,
                     *, n, h, w, cin, cout):
    k = KSIZE
    ho, wo = h - (k - 1), w - (k - 1)
    hp, wp = ho + 2, wo + 2
    wcin, wcout = w * cin, wp * cout
    count = float(n * hp * wp)        # BN element count over the padded tensor

    def full(shape):
        return pl.BlockSpec(shape, lambda i: (0, 0))

    kern = functools.partial(_down_block_kernel, n=n, k=k, count=count)
    return pl.pallas_call(
        kern,
        out_shape=jax.ShapeDtypeStruct((n * hp, wcout), jnp.float32),
        grid=(1,),
        in_specs=[full((n * h, wcin)),
                  full((k * wcin, wcout)), full((1, wcout)),
                  full((1, wcout)), full((1, wcout)),
                  full((k * wcout, wcout)), full((1, wcout)),
                  full((1, wcout)), full((1, wcout)),
                  full((wcout, wcout))],
        out_specs=full((n * hp, wcout)),
        compiler_params=_COMPILER_PARAMS,
    )(x2, w1, b1, g1, bt1, w2, b2, g2, bt2, pmat)


# ------------------------------------------------------ weight repacking glue

def _band_weights(wt, width):
    """Fold a (Cout, Cin, 3, 3) conv weight plus ReflectionPad2d(1) along W into
    a single K-merged block-Toeplitz matrix of shape (3*W*Cin, Wp*Cout)."""
    cout, cin, k, _ = wt.shape
    wo = width - (k - 1)
    wp = wo + 2                                   # == width for k=3, pad=1
    gather = np.zeros((width, wp, k), np.float32)
    for jp in range(wp):
        jc = 1 if jp == 0 else (wo - 2 if jp == wp - 1 else jp - 1)
        for kw in range(k):
            gather[jc + kw, jp, kw] = 1.0
    band = jnp.einsum("pjk,ochk->hpcjo", jnp.asarray(gather), wt)
    return band.reshape(k * width * cin, wp * cout).astype(MATMUL_DTYPE)


def _channel_match(width, c):
    """(W*C, W*C) 0/1 matrix: P[a, b] == 1 iff lanes a and b share a channel."""
    idx = np.arange(width * c) % c
    return jnp.asarray((idx[:, None] == idx[None, :]).astype(np.float32))


def _tile_lane(v, width):
    return jnp.tile(v.astype(jnp.float32), width).reshape(1, -1)


# ------------------------------------------------------------------ forward

def down_block_forward(x_nchw, params):
    """[Conv(3x3, valid) -> ReflectionPad(1) -> BatchNorm(batch stats) -> ReLU] x2."""
    n, cin, h, w = x_nchw.shape
    cout = params["w1"].shape[0]
    k = KSIZE
    ho, wo = h - (k - 1), w - (k - 1)
    assert ho >= 2 and wo >= 2, "ReflectionPad(1) needs conv output >= 2"
    hp, wp = ho + 2, wo + 2
    assert hp == h and wp == w        # k=3, pad=1 preserves spatial size

    # lane-dense activation layout: (N*H, W*C); lane index = w*C + c
    x2 = jnp.transpose(x_nchw, (0, 2, 3, 1)).astype(jnp.float32)
    x2 = x2.reshape(n * h, w * cin)

    out_flat = _down_block_call(
        x2,
        _band_weights(params["w1"], w), _tile_lane(params["b1"], w),
        _tile_lane(params["gamma1"], w), _tile_lane(params["beta1"], w),
        _band_weights(params["w2"], w), _tile_lane(params["b2"], w),
        _tile_lane(params["gamma2"], w), _tile_lane(params["beta2"], w),
        _channel_match(w, cout),
        n=n, h=h, w=w, cin=cin, cout=cout)

    out = out_flat.reshape(n, hp, wp, cout)
    return jnp.transpose(out, (0, 3, 1, 2))       # back to NCHW


# ------------------------------------------------------------- pure-JAX ref

def _reference_forward(x, params):
    def layer(x, wt, b, gamma, beta):
        y = jax.lax.conv_general_dilated(
            x, wt, window_strides=(1, 1), padding="VALID",
            dimension_numbers=("NCHW", "OIHW", "NCHW"))
        y = y + b[None, :, None, None]
        y = jnp.pad(y, ((0, 0), (0, 0), (1, 1), (1, 1)), mode="reflect")
        mean = jnp.mean(y, axis=(0, 2, 3), keepdims=True)
        var = jnp.mean((y - mean) ** 2, axis=(0, 2, 3), keepdims=True)
        y = (y - mean) * jax.lax.rsqrt(var + BN_EPS)
        y = y * gamma[None, :, None, None] + beta[None, :, None, None]
        return jnp.maximum(y, 0.0)

    y = layer(x, params["w1"], params["b1"], params["gamma1"], params["beta1"])
    return layer(y, params["w2"], params["b2"], params["gamma2"], params["beta2"])


# -------------------------------------------------------------------- params

def init_params(key, in_channels, out_channels, k=3):
    """Deterministic init mimicking PyTorch defaults (uniform +/- 1/sqrt(fan_in);
    BN weight=1, bias=0)."""
    ks = jax.random.split(key, 4)
    fan1 = in_channels * k * k
    fan2 = out_channels * k * k
    b1 = 1.0 / jnp.sqrt(fan1)
    b2 = 1.0 / jnp.sqrt(fan2)
    return {
        "w1": jax.random.uniform(ks[0], (out_channels, in_channels, k, k),
                                 jnp.float32, -b1, b1),
        "b1": jax.random.uniform(ks[1], (out_channels,), jnp.float32, -b1, b1),
        "gamma1": jnp.ones((out_channels,), jnp.float32),
        "beta1": jnp.zeros((out_channels,), jnp.float32),
        "w2": jax.random.uniform(ks[2], (out_channels, out_channels, k, k),
                                 jnp.float32, -b2, b2),
        "b2": jax.random.uniform(ks[3], (out_channels,), jnp.float32, -b2, b2),
        "gamma2": jnp.ones((out_channels,), jnp.float32),
        "beta2": jnp.zeros((out_channels,), jnp.float32),
    }


# ---------------------------------------------------------------------- main

if __name__ == "__main__":
    key = jax.random.PRNGKey(0)
    k_x, k_p = jax.random.split(key)

    in_channels, out_channels = 4, 8
    n, h, w = 2, 16, 16
    x = jax.random.normal(k_x, (n, in_channels, h, w), jnp.float32)  # NCHW

    params = init_params(k_p, in_channels, out_channels)

    out = jax.jit(down_block_forward)(x, params)
    out = jax.block_until_ready(out)

    assert out.shape == (n, out_channels, h, w), out.shape
    assert bool(jnp.all(jnp.isfinite(out)))
    assert bool(jnp.all(out >= 0.0))          # final ReLU

    # Pure-JAX f32 reference; tolerance covers bf16 MXU operands in the kernel.
    ref = jax.block_until_ready(jax.jit(_reference_forward)(x, params))
    err = float(jnp.max(jnp.abs(out - ref)))
    assert err < 5e-2, f"max abs error vs reference: {err}"

    print("KERNEL_OK")
</pallas_src>

<mosaic_0001>
module attributes {stable_mosaic.version = 11 : i64} {
  func.func @_down_block_kernel(%arg0: i32, %arg1: memref<32x64xf32, #tpu.memory_space<vmem>>, %arg2: memref<192x128xbf16, #tpu.memory_space<vmem>>, %arg3: memref<1x128xf32, #tpu.memory_space<vmem>>, %arg4: memref<1x128xf32, #tpu.memory_space<vmem>>, %arg5: memref<1x128xf32, #tpu.memory_space<vmem>>, %arg6: memref<384x128xbf16, #tpu.memory_space<vmem>>, %arg7: memref<1x128xf32, #tpu.memory_space<vmem>>, %arg8: memref<1x128xf32, #tpu.memory_space<vmem>>, %arg9: memref<1x128xf32, #tpu.memory_space<vmem>>, %arg10: memref<128x128xf32, #tpu.memory_space<vmem>>, %arg11: memref<32x128xf32, #tpu.memory_space<vmem>>) attributes {dimension_semantics = [#tpu.dimension_semantics<arbitrary>], iteration_bounds = array<i64: 1>, scalar_prefetch = 0 : i64, scratch_operands = 0 : i64, tpu.core_type = #tpu.core_type<tc>, window_params = [{pipeline_mode = #tpu.pipeline_mode<synchronous>, transform_indices = @transform_0, window_bounds = array<i64: 32, 64>}, {pipeline_mode = #tpu.pipeline_mode<synchronous>, transform_indices = @transform_1, window_bounds = array<i64: 192, 128>}, {pipeline_mode = #tpu.pipeline_mode<synchronous>, transform_indices = @transform_2, window_bounds = array<i64: 1, 128>}, {pipeline_mode = #tpu.pipeline_mode<synchronous>, transform_indices = @transform_3, window_bounds = array<i64: 1, 128>}, {pipeline_mode = #tpu.pipeline_mode<synchronous>, transform_indices = @transform_4, window_bounds = array<i64: 1, 128>}, {pipeline_mode = #tpu.pipeline_mode<synchronous>, transform_indices = @transform_5, window_bounds = array<i64: 384, 128>}, {pipeline_mode = #tpu.pipeline_mode<synchronous>, transform_indices = @transform_6, window_bounds = array<i64: 1, 128>}, {pipeline_mode = #tpu.pipeline_mode<synchronous>, transform_indices = @transform_7, window_bounds = array<i64: 1, 128>}, {pipeline_mode = #tpu.pipeline_mode<synchronous>, transform_indices = @transform_8, window_bounds = array<i64: 1, 128>}, {pipeline_mode = #tpu.pipeline_mode<synchronous>, transform_indices = @transform_9, window_bounds = array<i64: 128, 128>}, {pipeline_mode = #tpu.pipeline_mode<synchronous>, transform_indices = @transform_10, window_bounds = array<i64: 32, 128>}]} {
    %c0 = arith.constant 0 : index
    %c0_0 = arith.constant 0 : index
    %0 = vector.load %arg1[%c0, %c0_0] : memref<32x64xf32, #tpu.memory_space<vmem>>, vector<32x64xf32>
    %1 = vector.extract_strided_slice %0 {offsets = [0, 0], sizes = [14, 64], strides = [1, 1]} : vector<32x64xf32> to vector<14x64xf32>
    %2 = vector.extract_strided_slice %0 {offsets = [1, 0], sizes = [14, 64], strides = [1, 1]} : vector<32x64xf32> to vector<14x64xf32>
    %3 = vector.extract_strided_slice %0 {offsets = [2, 0], sizes = [14, 64], strides = [1, 1]} : vector<32x64xf32> to vector<14x64xf32>
    %4 = tpu.concatenate %1, %2, %3 in 1 : vector<14x64xf32>, vector<14x64xf32>, vector<14x64xf32> -> vector<14x192xf32>
    %5 = vector.extract_strided_slice %0 {offsets = [16, 0], sizes = [14, 64], strides = [1, 1]} : vector<32x64xf32> to vector<14x64xf32>
    %6 = vector.extract_strided_slice %0 {offsets = [17, 0], sizes = [14, 64], strides = [1, 1]} : vector<32x64xf32> to vector<14x64xf32>
    %7 = vector.extract_strided_slice %0 {offsets = [18, 0], sizes = [14, 64], strides = [1, 1]} : vector<32x64xf32> to vector<14x64xf32>
    %8 = tpu.concatenate %5, %6, %7 in 1 : vector<14x64xf32>, vector<14x64xf32>, vector<14x64xf32> -> vector<14x192xf32>
    %9 = tpu.concatenate %4, %8 in 0 : vector<14x192xf32>, vector<14x192xf32> -> vector<28x192xf32>
    %10 = arith.truncf %9 : vector<28x192xf32> to vector<28x192xbf16>
    %c0_1 = arith.constant 0 : index
    %c0_2 = arith.constant 0 : index
    %11 = vector.load %arg2[%c0_1, %c0_2] : memref<192x128xbf16, #tpu.memory_space<vmem>>, vector<192x128xbf16>
    %cst = arith.constant dense<0.000000e+00> : vector<28x128xf32>
    %12 = tpu.matmul %10, %11, %cst {dimension_numbers = #tpu.dot_dimension_numbers<[1], [0], [0], [1], [0, 0, 1, 1], [], []>} : vector<28x192xbf16>, vector<192x128xbf16>, vector<28x128xf32> -> vector<28x128xf32>
    %c0_3 = arith.constant 0 : index
    %c0_4 = arith.constant 0 : index
    %13 = vector.load %arg3[%c0_3, %c0_4] : memref<1x128xf32, #tpu.memory_space<vmem>>, vector<1x128xf32>
    %14 = vector.broadcast %13 : vector<1x128xf32> to vector<28x128xf32>
    %15 = arith.addf %12, %14 : vector<28x128xf32>
    %16 = vector.extract_strided_slice %15 {offsets = [0, 0], sizes = [14, 128], strides = [1, 1]} : vector<28x128xf32> to vector<14x128xf32>
    %17 = vector.extract_strided_slice %16 {offsets = [1, 0], sizes = [1, 128], strides = [1, 1]} : vector<14x128xf32> to vector<1x128xf32>
    %18 = vector.extract_strided_slice %16 {offsets = [12, 0], sizes = [1, 128], strides = [1, 1]} : vector<14x128xf32> to vector<1x128xf32>
    %19 = vector.extract_strided_slice %15 {offsets = [14, 0], sizes = [14, 128], strides = [1, 1]} : vector<28x128xf32> to vector<14x128xf32>
    %20 = vector.extract_strided_slice %19 {offsets = [1, 0], sizes = [1, 128], strides = [1, 1]} : vector<14x128xf32> to vector<1x128xf32>
    %21 = vector.extract_strided_slice %19 {offsets = [12, 0], sizes = [1, 128], strides = [1, 1]} : vector<14x128xf32> to vector<1x128xf32>
    %22 = tpu.concatenate %17, %16, %18, %20, %19, %21 in 0 : vector<1x128xf32>, vector<14x128xf32>, vector<1x128xf32>, vector<1x128xf32>, vector<14x128xf32>, vector<1x128xf32> -> vector<32x128xf32>
    %cst_5 = arith.constant dense<0.000000e+00> : vector<128xf32>
    %23 = vector.multi_reduction <add>, %22, %cst_5 [0] : vector<32x128xf32> to vector<128xf32>
    %24 = vector.shape_cast %23 : vector<128xf32> to vector<1x128xf32>
    %25 = arith.mulf %22, %22 : vector<32x128xf32>
    %cst_6 = arith.constant dense<0.000000e+00> : vector<128xf32>
    %26 = vector.multi_reduction <add>, %25, %cst_6 [0] : vector<32x128xf32> to vector<128xf32>
    %27 = vector.shape_cast %26 : vector<128xf32> to vector<1x128xf32>
    %c0_7 = arith.constant 0 : index
    %c0_8 = arith.constant 0 : index
    %28 = vector.load %arg10[%c0_7, %c0_8] : memref<128x128xf32, #tpu.memory_space<vmem>>, vector<128x128xf32>
    %cst_9 = arith.constant dense<0.000000e+00> : vector<1x128xf32>
    %29 = tpu.matmul %24, %28, %cst_9 {dimension_numbers = #tpu.dot_dimension_numbers<[1], [0], [0], [1], [0, 0, 1, 1], [], []>} : vector<1x128xf32>, vector<128x128xf32>, vector<1x128xf32> -> vector<1x128xf32>
    %cst_10 = arith.constant 0.001953125 : f32
    %30 = vector.broadcast %cst_10 : f32 to vector<1x128xf32>
    %31 = arith.mulf %29, %30 : vector<1x128xf32>
    %c0_11 = arith.constant 0 : index
    %c0_12 = arith.constant 0 : index
    %32 = vector.load %arg10[%c0_11, %c0_12] : memref<128x128xf32, #tpu.memory_space<vmem>>, vector<128x128xf32>
    %cst_13 = arith.constant dense<0.000000e+00> : vector<1x128xf32>
    %33 = tpu.matmul %27, %32, %cst_13 {dimension_numbers = #tpu.dot_dimension_numbers<[1], [0], [0], [1], [0, 0, 1, 1], [], []>} : vector<1x128xf32>, vector<128x128xf32>, vector<1x128xf32> -> vector<1x128xf32>
    %cst_14 = arith.constant 0.001953125 : f32
    %34 = vector.broadcast %cst_14 : f32 to vector<1x128xf32>
    %35 = arith.mulf %33, %34 : vector<1x128xf32>
    %36 = arith.mulf %31, %31 : vector<1x128xf32>
    %37 = arith.subf %35, %36 : vector<1x128xf32>
    %cst_15 = arith.constant 9.99999974E-6 : f32
    %38 = vector.broadcast %cst_15 : f32 to vector<1x128xf32>
    %39 = arith.addf %37, %38 : vector<1x128xf32>
    %40 = math.rsqrt %39 : vector<1x128xf32>
    %c0_16 = arith.constant 0 : index
    %c0_17 = arith.constant 0 : index
    %41 = vector.load %arg4[%c0_16, %c0_17] : memref<1x128xf32, #tpu.memory_space<vmem>>, vector<1x128xf32>
    %42 = arith.mulf %40, %41 : vector<1x128xf32>
    %c0_18 = arith.constant 0 : index
    %c0_19 = arith.constant 0 : index
    %43 = vector.load %arg5[%c0_18, %c0_19] : memref<1x128xf32, #tpu.memory_space<vmem>>, vector<1x128xf32>
    %44 = arith.mulf %31, %42 : vector<1x128xf32>
    %45 = arith.subf %43, %44 : vector<1x128xf32>
    %46 = vector.broadcast %42 : vector<1x128xf32> to vector<32x128xf32>
    %47 = arith.mulf %22, %46 : vector<32x128xf32>
    %48 = vector.broadcast %45 : vector<1x128xf32> to vector<32x128xf32>
    %49 = arith.addf %47, %48 : vector<32x128xf32>
    %cst_20 = arith.constant 0.000000e+00 : f32
    %50 = vector.broadcast %cst_20 : f32 to vector<32x128xf32>
    %51 = arith.maximumf %49, %50 : vector<32x128xf32>
    %52 = vector.extract_strided_slice %51 {offsets = [0, 0], sizes = [14, 128], strides = [1, 1]} : vector<32x128xf32> to vector<14x128xf32>
    %53 = vector.extract_strided_slice %51 {offsets = [1, 0], sizes = [14, 128], strides = [1, 1]} : vector<32x128xf32> to vector<14x128xf32>
    %54 = vector.extract_strided_slice %51 {offsets = [2, 0], sizes = [14, 128], strides = [1, 1]} : vector<32x128xf32> to vector<14x128xf32>
    %55 = tpu.concatenate %52, %53, %54 in 1 : vector<14x128xf32>, vector<14x128xf32>, vector<14x128xf32> -> vector<14x384xf32>
    %56 = vector.extract_strided_slice %51 {offsets = [16, 0], sizes = [14, 128], strides = [1, 1]} : vector<32x128xf32> to vector<14x128xf32>
    %57 = vector.extract_strided_slice %51 {offsets = [17, 0], sizes = [14, 128], strides = [1, 1]} : vector<32x128xf32> to vector<14x128xf32>
    %58 = vector.extract_strided_slice %51 {offsets = [18, 0], sizes = [14, 128], strides = [1, 1]} : vector<32x128xf32> to vector<14x128xf32>
    %59 = tpu.concatenate %56, %57, %58 in 1 : vector<14x128xf32>, vector<14x128xf32>, vector<14x128xf32> -> vector<14x384xf32>
    %60 = tpu.concatenate %55, %59 in 0 : vector<14x384xf32>, vector<14x384xf32> -> vector<28x384xf32>
    %61 = arith.truncf %60 : vector<28x384xf32> to vector<28x384xbf16>
    %c0_21 = arith.constant 0 : index
    %c0_22 = arith.constant 0 : index
    %62 = vector.load %arg6[%c0_21, %c0_22] : memref<384x128xbf16, #tpu.memory_space<vmem>>, vector<384x128xbf16>
    %cst_23 = arith.constant dense<0.000000e+00> : vector<28x128xf32>
    %63 = tpu.matmul %61, %62, %cst_23 {dimension_numbers = #tpu.dot_dimension_numbers<[1], [0], [0], [1], [0, 0, 1, 1], [], []>} : vector<28x384xbf16>, vector<384x128xbf16>, vector<28x128xf32> -> vector<28x128xf32>
    %c0_24 = arith.constant 0 : index
    %c0_25 = arith.constant 0 : index
    %64 = vector.load %arg7[%c0_24, %c0_25] : memref<1x128xf32, #tpu.memory_space<vmem>>, vector<1x128xf32>
    %65 = vector.broadcast %64 : vector<1x128xf32> to vector<28x128xf32>
    %66 = arith.addf %63, %65 : vector<28x128xf32>
    %67 = vector.extract_strided_slice %66 {offsets = [0, 0], sizes = [14, 128], strides = [1, 1]} : vector<28x128xf32> to vector<14x128xf32>
    %68 = vector.extract_strided_slice %67 {offsets = [1, 0], sizes = [1, 128], strides = [1, 1]} : vector<14x128xf32> to vector<1x128xf32>
    %69 = vector.extract_strided_slice %67 {offsets = [12, 0], sizes = [1, 128], strides = [1, 1]} : vector<14x128xf32> to vector<1x128xf32>
    %70 = vector.extract_strided_slice %66 {offsets = [14, 0], sizes = [14, 128], strides = [1, 1]} : vector<28x128xf32> to vector<14x128xf32>
    %71 = vector.extract_strided_slice %70 {offsets = [1, 0], sizes = [1, 128], strides = [1, 1]} : vector<14x128xf32> to vector<1x128xf32>
    %72 = vector.extract_strided_slice %70 {offsets = [12, 0], sizes = [1, 128], strides = [1, 1]} : vector<14x128xf32> to vector<1x128xf32>
    %73 = tpu.concatenate %68, %67, %69, %71, %70, %72 in 0 : vector<1x128xf32>, vector<14x128xf32>, vector<1x128xf32>, vector<1x128xf32>, vector<14x128xf32>, vector<1x128xf32> -> vector<32x128xf32>
    %cst_26 = arith.constant dense<0.000000e+00> : vector<128xf32>
    %74 = vector.multi_reduction <add>, %73, %cst_26 [0] : vector<32x128xf32> to vector<128xf32>
    %75 = vector.shape_cast %74 : vector<128xf32> to vector<1x128xf32>
    %76 = arith.mulf %73, %73 : vector<32x128xf32>
    %cst_27 = arith.constant dense<0.000000e+00> : vector<128xf32>
    %77 = vector.multi_reduction <add>, %76, %cst_27 [0] : vector<32x128xf32> to vector<128xf32>
    %78 = vector.shape_cast %77 : vector<128xf32> to vector<1x128xf32>
    %c0_28 = arith.constant 0 : index
    %c0_29 = arith.constant 0 : index
    %79 = vector.load %arg10[%c0_28, %c0_29] : memref<128x128xf32, #tpu.memory_space<vmem>>, vector<128x128xf32>
    %cst_30 = arith.constant dense<0.000000e+00> : vector<1x128xf32>
    %80 = tpu.matmul %75, %79, %cst_30 {dimension_numbers = #tpu.dot_dimension_numbers<[1], [0], [0], [1], [0, 0, 1, 1], [], []>} : vector<1x128xf32>, vector<128x128xf32>, vector<1x128xf32> -> vector<1x128xf32>
    %cst_31 = arith.constant 0.001953125 : f32
    %81 = vector.broadcast %cst_31 : f32 to vector<1x128xf32>
    %82 = arith.mulf %80, %81 : vector<1x128xf32>
    %c0_32 = arith.constant 0 : index
    %c0_33 = arith.constant 0 : index
    %83 = vector.load %arg10[%c0_32, %c0_33] : memref<128x128xf32, #tpu.memory_space<vmem>>, vector<128x128xf32>
    %cst_34 = arith.constant dense<0.000000e+00> : vector<1x128xf32>
    %84 = tpu.matmul %78, %83, %cst_34 {dimension_numbers = #tpu.dot_dimension_numbers<[1], [0], [0], [1], [0, 0, 1, 1], [], []>} : vector<1x128xf32>, vector<128x128xf32>, vector<1x128xf32> -> vector<1x128xf32>
    %cst_35 = arith.constant 0.001953125 : f32
    %85 = vector.broadcast %cst_35 : f32 to vector<1x128xf32>
    %86 = arith.mulf %84, %85 : vector<1x128xf32>
    %87 = arith.mulf %82, %82 : vector<1x128xf32>
    %88 = arith.subf %86, %87 : vector<1x128xf32>
    %cst_36 = arith.constant 9.99999974E-6 : f32
    %89 = vector.broadcast %cst_36 : f32 to vector<1x128xf32>
    %90 = arith.addf %88, %89 : vector<1x128xf32>
    %91 = math.rsqrt %90 : vector<1x128xf32>
    %c0_37 = arith.constant 0 : index
    %c0_38 = arith.constant 0 : index
    %92 = vector.load %arg8[%c0_37, %c0_38] : memref<1x128xf32, #tpu.memory_space<vmem>>, vector<1x128xf32>
    %93 = arith.mulf %91, %92 : vector<1x128xf32>
    %c0_39 = arith.constant 0 : index
    %c0_40 = arith.constant 0 : index
    %94 = vector.load %arg9[%c0_39, %c0_40] : memref<1x128xf32, #tpu.memory_space<vmem>>, vector<1x128xf32>
    %95 = arith.mulf %82, %93 : vector<1x128xf32>
    %96 = arith.subf %94, %95 : vector<1x128xf32>
    %97 = vector.broadcast %93 : vector<1x128xf32> to vector<32x128xf32>
    %98 = arith.mulf %73, %97 : vector<32x128xf32>
    %99 = vector.broadcast %96 : vector<1x128xf32> to vector<32x128xf32>
    %100 = arith.addf %98, %99 : vector<32x128xf32>
    %cst_41 = arith.constant 0.000000e+00 : f32
    %101 = vector.broadcast %cst_41 : f32 to vector<32x128xf32>
    %102 = arith.maximumf %100, %101 : vector<32x128xf32>
    %c0_42 = arith.constant 0 : index
    %c0_43 = arith.constant 0 : index
    %103 = vector.load %arg11[%c0_42, %c0_43] : memref<32x128xf32, #tpu.memory_space<vmem>>, vector<32x128xf32>
    tpu.vector_store %arg11[%c0_42, %c0_43], %102 {strides = array<i32>} : memref<32x128xf32, #tpu.memory_space<vmem>>, vector<32x128xf32>,
    return
  }
  func.func @transform_0(%arg0: i32) -> (i32, i32) {
    %c0_i32 = arith.constant 0 : i32
    %c0_i32_0 = arith.constant 0 : i32
    %c0_i32_1 = arith.constant 0 : i32
    return %c0_i32, %c0_i32_0 : i32, i32
  }
  func.func @transform_1(%arg0: i32) -> (i32, i32) {
    %c0_i32 = arith.constant 0 : i32
    %c0_i32_0 = arith.constant 0 : i32
    %c0_i32_1 = arith.constant 0 : i32
    return %c0_i32, %c0_i32_0 : i32, i32
  }
  func.func @transform_2(%arg0: i32) -> (i32, i32) {
    %c0_i32 = arith.constant 0 : i32
    %c0_i32_0 = arith.constant 0 : i32
    %c0_i32_1 = arith.constant 0 : i32
    return %c0_i32, %c0_i32_0 : i32, i32
  }
  func.func @transform_3(%arg0: i32) -> (i32, i32) {
    %c0_i32 = arith.constant 0 : i32
    %c0_i32_0 = arith.constant 0 : i32
    %c0_i32_1 = arith.constant 0 : i32
    return %c0_i32, %c0_i32_0 : i32, i32
  }
  func.func @transform_4(%arg0: i32) -> (i32, i32) {
    %c0_i32 = arith.constant 0 : i32
    %c0_i32_0 = arith.constant 0 : i32
    %c0_i32_1 = arith.constant 0 : i32
    return %c0_i32, %c0_i32_0 : i32, i32
  }
  func.func @transform_5(%arg0: i32) -> (i32, i32) {
    %c0_i32 = arith.constant 0 : i32
    %c0_i32_0 = arith.constant 0 : i32
    %c0_i32_1 = arith.constant 0 : i32
    return %c0_i32, %c0_i32_0 : i32, i32
  }
  func.func @transform_6(%arg0: i32) -> (i32, i32) {
    %c0_i32 = arith.constant 0 : i32
    %c0_i32_0 = arith.constant 0 : i32
    %c0_i32_1 = arith.constant 0 : i32
    return %c0_i32, %c0_i32_0 : i32, i32
  }
  func.func @transform_7(%arg0: i32) -> (i32, i32) {
    %c0_i32 = arith.constant 0 : i32
    %c0_i32_0 = arith.constant 0 : i32
    %c0_i32_1 = arith.constant 0 : i32
    return %c0_i32, %c0_i32_0 : i32, i32
  }
  func.func @transform_8(%arg0: i32) -> (i32, i32) {
    %c0_i32 = arith.constant 0 : i32
    %c0_i32_0 = arith.constant 0 : i32
    %c0_i32_1 = arith.constant 0 : i32
    return %c0_i32, %c0_i32_0 : i32, i32
  }
  func.func @transform_9(%arg0: i32) -> (i32, i32) {
    %c0_i32 = arith.constant 0 : i32
    %c0_i32_0 = arith.constant 0 : i32
    %c0_i32_1 = arith.constant 0 : i32
    return %c0_i32, %c0_i32_0 : i32, i32
  }
  func.func @transform_10(%arg0: i32) -> (i32, i32) {
    %c0_i32 = arith.constant 0 : i32
    %c0_i32_0 = arith.constant 0 : i32
    %c0_i32_1 = arith.constant 0 : i32
    return %c0_i32, %c0_i32_0 : i32, i32
  }
}

</mosaic_0001>

<bundles_post_ra>
// kernel: tile.33
= control target key start
LH: loop header
LB: loop body
LE: loop exit
PB: predicated region body
PF: predicated region fallthrough
CT: control target
= control target key end

     0   :  { %s28_s0 = inlined_call_operand.vmem [shape: f32[8], index: 0, kind: input, shape index: {}]   ;;  %s29_s1 = inlined_call_operand.vmem [shape: f32[16,8], index: 1, kind: output, shape index: {}]  }
   0x1   :  { %v4_v0 = vld [vmem:[%s28_s0] ss:$0 sm:$0xff] }
   0x2   :  { %5 = vst [vmem:[%s29_s1] sm:$0xff] %v4_v0  ;;  %8 = vst [vmem:[%s29_s1 + $0x8] sm:$0xff] %v4_v0 }

// kernel: tile.34
= control target key start
LH: loop header
LB: loop body
LE: loop exit
PB: predicated region body
PF: predicated region fallthrough
CT: control target
= control target key end

     0   :  { %s133_s10 = smov 120   ;;  %s134_s11 = smov 104   ;;  %vm3_vm0 = vcmask 64512   ;;  %vm9_vm1 = vcmask 1048512   ;;  %vm15_vm2 = vcmask 982912   ;;  %vm21_vm3 = vcmask 917312   ;;  %s209_s0 = inlined_call_operand.vmem [shape: f32[16,8], index: 0, kind: input, shape index: {}]   ;;  %s210_s1 = inlined_call_operand.vmem [shape: f32[1,128], index: 1, kind: output, shape index: {}]  }
   0x1   :  { %v103_v0 = vld [vmem:[%s209_s0 + $0xf] sm:$0x1]   ;;  %v105_v1 = vld [vmem:[%s209_s0 + $0xd] sm:$0x1]   ;;  %v104_v2 = vld [vmem:[%s209_s0 + $0xe] sm:$0x1]  }
   0x2   :  { %7 = vrot.lane.b32.xlu0 %v103_v0, %s133_s10  ;;  %19 = vrot.lane.b32.xlu1 %v105_v1, %s134_s11  ;;  %v106_v3 = vld [vmem:[%s209_s0 + $0xc] sm:$0x1]   ;;  %s135_s16 = smov 112   ;;  %s136_s17 = smov 96   ;;  %v107_v4 = vld [vmem:[%s209_s0 + $0xb] sm:$0x1]  }
   0x3   :  { %v108_v5 = vld [vmem:[%s209_s0 + $0xa] sm:$0x1]   ;;  %v2_v6 = vld [vmem:[%s209_s0] sm:$0x1]   ;;  %s137_s24 = smov 88   ;;  %s138_s25 = smov 80  }
   0x4   :  { %4 = vst.msk [vmem:[#allocation0] sm:$0x1] %vm3_vm0, %v2_v6   ;;  %v109_v7 = vld [vmem:[%s209_s0 + $0x9] sm:$0x1]   ;;  %v110_v8 = vld [vmem:[%s209_s0 + $0x8] sm:$0x1]  }
   0x5   :  { %s139_s30 = smov 72   ;;  %s140_s2 = smov 64   ;;  %v111_v9 = vld [vmem:[%s209_s0 + $0x7] sm:$0x1]   ;;  %v112_v10 = vld [vmem:[%s209_s0 + $0x6] sm:$0x1]  }
   0x6   :  { %13 = vrot.lane.b32.xlu0 %v104_v2, %s135_s16  ;;  %25 = vrot.lane.b32.xlu1 %v106_v3, %s136_s17  ;;  %s141_s7 = smov 56   ;;  %s142_s8 = smov 48   ;;  %v113_v11 = vld [vmem:[%s209_s0 + $0x5] sm:$0x1]   ;;  %v114_v12 = vld [vmem:[%s209_s0 + $0x4] sm:$0x1]  }
   0x7   :  { %s143_s13 = smov 40   ;;  %s144_s14 = smov 32   ;;  %v115_v13 = vld [vmem:[%s209_s0 + $0x3] sm:$0x1]   ;;  %v116_v14 = vld [vmem:[%s209_s0 + $0x2] sm:$0x1]  }
   0x8   :  { %s145_s19 = smov 24   ;;  %s146_s20 = smov 16   ;;  %v117_v15 = vld [vmem:[%s209_s0 + $0x1] sm:$0x1]   ;;  %vm27_vm4 = vcmask 851712   ;;  %vm33_vm5 = vcmask 786112  }
   0x9   :  { %s147_s0 = smov 8   ;;  %vm39_vm6 = vcmask 720512   ;;  %vm45_vm7 = vcmask 654912   ;;  %vm51_vm8 = vcmask 589312   ;;  %vm57_vm9 = vcmask 523712  }
   0xa   :  { %31 = vrot.lane.b32.xlu0 %v107_v4, %s137_s24  ;;  %37 = vrot.lane.b32.xlu1 %v108_v5, %s138_s25  ;;  %vm63_vm10 = vcmask 458112   ;;  %vm69_vm11 = vcmask 392512   ;;  %vm75_vm12 = vcmask 326912   ;;  %vm81_vm13 = vcmask 261312  }
   0xb   :  { %vm87_vm14 = vcmask 195712   ;;  %vm93_vm15 = vcmask 130112  }
   0xe   :  { %43 = vrot.lane.b32.xlu0 %v109_v7, %s139_s30  ;;  %49 = vrot.lane.b32.xlu1 %v110_v8, %s140_s2 }
  0x12   :  { %55 = vrot.lane.b32.xlu0 %v111_v9, %s141_s7  ;;  %61 = vrot.lane.b32.xlu1 %v112_v10, %s142_s8 }
  0x16   :  { %67 = vrot.lane.b32.xlu0 %v113_v11, %s143_s13  ;;  %73 = vrot.lane.b32.xlu1 %v114_v12, %s144_s14 }
  0x1a   :  { %79 = vrot.lane.b32.xlu0 %v115_v13, %s145_s19  ;;  %85 = vrot.lane.b32.xlu1 %v116_v14, %s146_s20 }
  0x1e   :  { %91 = vrot.lane.b32.xlu0 %v117_v15, %s147_s0 }
  0x74   :  { %v8_v16 = vpop.permute.xlu0 %7   ;;  %v20_v17 = vpop.permute.xlu1 %19  }
  0x75   :  { %10 = vst.msk [vmem:[#allocation0] sm:$0x1] %vm9_vm1, %v8_v16  }
  0x78   :  { %v14_v18 = vpop.permute.xlu0 %13   ;;  %v26_v19 = vpop.permute.xlu1 %25  }
  0x79   :  { %16 = vst.msk [vmem:[#allocation0] sm:$0x1] %vm15_vm2, %v14_v18  }
  0x7a   :  { %22 = vst.msk [vmem:[#allocation0] sm:$0x1] %vm21_vm3, %v20_v17  }
  0x7b   :  { %28 = vst.msk [vmem:[#allocation0] sm:$0x1] %vm27_vm4, %v26_v19  }
  0x7c   :  { %v32_v20 = vpop.permute.xlu0 %31   ;;  %v38_v21 = vpop.permute.xlu1 %37  }
  0x7d   :  { %34 = vst.msk [vmem:[#allocation0] sm:$0x1] %vm33_vm5, %v32_v20  }
  0x7e   :  { %40 = vst.msk [vmem:[#allocation0] sm:$0x1] %vm39_vm6, %v38_v21  }
  0x80   :  { %v44_v22 = vpop.permute.xlu0 %43   ;;  %v50_v23 = vpop.permute.xlu1 %49  }
  0x81   :  { %46 = vst.msk [vmem:[#allocation0] sm:$0x1] %vm45_vm7, %v44_v22  }
  0x82   :  { %52 = vst.msk [vmem:[#allocation0] sm:$0x1] %vm51_vm8, %v50_v23  }
  0x84   :  { %v56_v24 = vpop.permute.xlu0 %55   ;;  %v62_v25 = vpop.permute.xlu1 %61  }
  0x85   :  { %58 = vst.msk [vmem:[#allocation0] sm:$0x1] %vm57_vm9, %v56_v24  }
  0x86   :  { %64 = vst.msk [vmem:[#allocation0] sm:$0x1] %vm63_vm10, %v62_v25  }
  0x88   :  { %v68_v26 = vpop.permute.xlu0 %67   ;;  %v74_v27 = vpop.permute.xlu1 %73  }
  0x89   :  { %70 = vst.msk [vmem:[#allocation0] sm:$0x1] %vm69_vm11, %v68_v26  }
  0x8a   :  { %76 = vst.msk [vmem:[#allocation0] sm:$0x1] %vm75_vm12, %v74_v27  }
  0x8c   :  { %v80_v28 = vpop.permute.xlu0 %79   ;;  %v86_v29 = vpop.permute.xlu1 %85  }
  0x8d   :  { %82 = vst.msk [vmem:[#allocation0] sm:$0x1] %vm81_vm13, %v80_v28  }
  0x8e   :  { %88 = vst.msk [vmem:[#allocation0] sm:$0x1] %vm87_vm14, %v86_v29  }
  0x90   :  { %v92_v30 = vpop.permute.xlu0 %91  }
  0x91   :  { %94 = vst.msk [vmem:[#allocation0] sm:$0x1] %vm93_vm15, %v92_v30  }
  0x98   :  { %v99_v31 = vld [vmem:[#allocation0] sm:$0x1] }
  0x99   :  { %102 = vst [vmem:[%s210_s1] sm:$0x1] %v99_v31 }

// kernel: down_block_forward.1
= control target key start
LH: loop header
LB: loop body
LE: loop exit
PB: predicated region body
PF: predicated region fallthrough
CT: control target
= control target key end

     0   :  { %vm42_vm0 = vcmask 1046528   ;;  %v1419_v3 = vmov 0   ;;  %vm52_vm1 = vcmask 1045504   ;;  %s1420_s23 = smov 64   ;;  %vm58_vm2 = vcmask 523264   ;;  %s1931_s0 = inlined_call_operand.vmem [shape: f32[32,64], index: 0, kind: input, shape index: {}]   ;;  %s1932_s1 = inlined_call_operand.vmem [shape: bf16[192,128], index: 1, kind: input, shape index: {}]   ;;  %s1933_s9 = inlined_call_operand.vmem [shape: f32[128,128], index: 9, kind: input, shape index: {}]   ;;  %s1934_s2 = inlined_call_operand.vmem [shape: f32[1,128], index: 2, kind: input, shape index: {}]   ;;  %s1935_s5 = inlined_call_operand.vmem [shape: bf16[384,128], index: 5, kind: input, shape index: {}]   ;;  %s1936_s3 = inlined_call_operand.vmem [shape: f32[1,128], index: 3, kind: input, shape index: {}]   ;;  %s1937_s4 = inlined_call_operand.vmem [shape: f32[1,128], index: 4, kind: input, shape index: {}]   ;;  %s1938_s6 = inlined_call_operand.vmem [shape: f32[1,128], index: 6, kind: input, shape index: {}]   ;;  %s1939_s7 = inlined_call_operand.vmem [shape: f32[1,128], index: 7, kind: input, shape index: {}]   ;;  %s1940_s8 = inlined_call_operand.vmem [shape: f32[1,128], index: 8, kind: input, shape index: {}]   ;;  %s1941_s10 = inlined_call_operand.vmem [shape: f32[32,128], index: 10, kind: output, shape index: {}]  }
   0x1   :  { %v1481_v0 = vld [vmem:[%s1931_s0 + $0x8] sm:$0xff]  ;;  %v1486_v1 = vld [vmem:[%s1931_s0 + $0x10] sm:$0xff]  ;;  %v1491_v2 = vld [vmem:[%s1931_s0 + $0x18] sm:$0xff]  ;;  %206 = vmatprep.subr.bf16.mxu0 %v1419_v3  ;;  %v1421_v51 = vmov 0.0   ;;  %vm1422_vm3 = vmmov 0   ;;  %vm259_vm4 = vcmask 1040384  }
   0x2   :  { %v44_v4 = vrot.slane %v1481_v0, 1  ;;  %v63_v5 = vrot.slane %v1486_v1, 1  ;;  %v64_v6 = vrot.slane %v1491_v2, 1  ;;  %v72_v7 = vrot.slane %v1486_v1, 2  ;;  %v1500_v8 = vld [vmem:[%s1931_s0] sm:$0xff]  ;;  %v1379_v9 = vld [vmem:[%s1932_s1 + $0x38] sm:$0xff]   ;;  %1210 = vmatprep.subr.mxu1 %v1421_v51  ;;  %1242 = vmatprep.mubr.msk.f32.mxu1 %vm1422_vm3, %v1421_v51 }
   0x3   :  { %v73_v10 = vrot.slane %v1491_v2, 2  ;;  %v43_v11 = vrot.slane %v1500_v8, 1  ;;  %207 = vmatpush1.bf16.msra.mxu0 %v1379_v9  ;;  %v1380_v13 = vld [vmem:[%s1932_s1 + $0x30] sm:$0xff]   ;;  %v53_v14 = vrot.slane %v1500_v8, 2  ;;  %v54_v16 = vrot.slane %v1481_v0, 2  ;;  %v1381_v22 = vld [vmem:[%s1932_s1 + $0x28] sm:$0xff]  }
   0x4   :  { %v65_v12 = vsel %vm42_vm0, %v63_v5, %v64_v6  ;;  %68 = vrot.lane.b32.xlu1 %v64_v6, %s1420_s23  ;;  %208 = vmatprep.subr.bf16.mxu0 %v1419_v3  ;;  %v1382_v27 = vld [vmem:[%s1932_s1 + $0x20] sm:$0xff]   ;;  %v1383_v28 = vld [vmem:[%s1932_s1 + $0x18] sm:$0xff]   ;;  %v1384_v29 = vld [vmem:[%s1932_s1 + $0x10] sm:$0xff]   ;;  %vm270_vm5 = vcmask 1042432  }
   0x5   :  { %v1374_v15 = vpack.i.bf16 %v44_v4, %v65_v12  ;;  %v74_v17 = vsel %vm52_vm1, %v72_v7, %v73_v10  ;;  %v55_v19 = vsel %vm52_vm1, %v53_v14, %v54_v16  ;;  %v83_v20 = vrot.slane %v73_v10, 2  ;;  %v1385_v30 = vld [vmem:[%s1932_s1 + $0x8] sm:$0xff]   ;;  %v1386_v31 = vld [vmem:[%s1932_s1] sm:$0xff]   ;;  %v1387_v32 = vld [vmem:[%s1932_s1 + $0x58] sm:$0xff]  }
   0x6   :  { %v80_v18 = vrot.slane %v74_v17, 2  ;;  %v45_v21 = vsel %vm42_vm0, %v43_v11, %v44_v4  ;;  %v1388_v33 = vld [vmem:[%s1932_s1 + $0x50] sm:$0xff]   ;;  %v1389_v34 = vld [vmem:[%s1932_s1 + $0x48] sm:$0xff]   ;;  %v1390_v35 = vld [vmem:[%s1932_s1 + $0x40] sm:$0xff]  }
   0x7   :  { %1375 = vrot.lane.b32.xlu0 %v1374_v15, %s1420_s23  ;;  %209 = vmatpush1.bf16.msra.mxu0 %v1380_v13  ;;  %v1564_v52 = vld [vmem:[%s1933_s9 + $0x78] sm:$0xff]  ;;  %v1571_v53 = vld [vmem:[%s1933_s9 + $0x70] sm:$0xff]  ;;  %v1578_v54 = vld [vmem:[%s1933_s9 + $0x68] sm:$0xff] }
   0x8   :  { %v92_v23 = vsel %vm52_vm1, %v54_v16, %v80_v18  ;;  %210 = vmatprep.subr.bf16.mxu0 %v1419_v3  ;;  %v84_v25 = vsel %vm52_vm1, %v80_v18, %v83_v20  ;;  %1211 = vmatpush3.msra.mxu1 %v1564_v52  ;;  %v1585_v55 = vld [vmem:[%s1933_s9 + $0x60] sm:$0xff]  ;;  %v1592_v56 = vld [vmem:[%s1933_s9 + $0x58] sm:$0xff]  ;;  %v1599_v57 = vld [vmem:[%s1933_s9 + $0x50] sm:$0xff] }
   0x9   :  { %v94_v24 = vpack.c.bf16 %v92_v23, %v55_v19  ;;  %v96_v26 = vpack.c.bf16 %v83_v20, %v84_v25  ;;  %1212 = vmatprep.subr.mxu1 %v1421_v51  ;;  %v1606_v58 = vld [vmem:[%s1933_s9 + $0x48] sm:$0xff]  ;;  %v1613_v59 = vld [vmem:[%s1933_s9 + $0x40] sm:$0xff]  ;;  %v1620_v60 = vld [vmem:[%s1933_s9 + $0x38] sm:$0xff] }
   0xa   :  { %1213 = vmatpush3.msra.mxu1 %v1571_v53  ;;  %v1627_v61 = vld [vmem:[%s1933_s9 + $0x30] sm:$0xff]  ;;  %v1634_v62 = vld [vmem:[%s1933_s9 + $0x28] sm:$0xff]  ;;  %v1641_v63 = vld [vmem:[%s1933_s9 + $0x20] sm:$0xff] }
   0xb   :  { %46 = vrot.lane.b32.xlu0 %v45_v21, %s1420_s23  ;;  %1077 = vmatprep.mubr.msk.bf16.mxu0 %vm58_vm2, %v94_v24  ;;  %v1064_v4 = vld [vmem:[%s1934_s2] ss:$0 sm:$0xff] }
   0xc   :  { %211 = vmatpush1.bf16.msra.mxu0 %v1381_v22  ;;  %1214 = vmatprep.subr.mxu1 %v1421_v51 }
   0xd   :  { %212 = vmatprep.subr.bf16.mxu0 %v1419_v3  ;;  %1215 = vmatpush3.msra.mxu1 %v1578_v54 }
   0xe   :  { %1216 = vmatprep.subr.mxu1 %v1421_v51 }
   0xf   :  { %1217 = vmatpush3.msra.mxu1 %v1585_v55 }
  0x10   :  { %213 = vmatpush1.bf16.msra.mxu0 %v1382_v27  ;;  %1218 = vmatprep.subr.mxu1 %v1421_v51 }
  0x11   :  { %214 = vmatprep.subr.bf16.mxu0 %v1419_v3  ;;  %1219 = vmatpush3.msra.mxu1 %v1592_v56 }
  0x12   :  { %1220 = vmatprep.subr.mxu1 %v1421_v51 }
  0x13   :  { %1221 = vmatpush3.msra.mxu1 %v1599_v57 }
  0x14   :  { %215 = vmatpush1.bf16.msra.mxu0 %v1383_v28  ;;  %1222 = vmatprep.subr.mxu1 %v1421_v51 }
  0x15   :  { %216 = vmatprep.subr.bf16.mxu0 %v1419_v3  ;;  %1223 = vmatpush3.msra.mxu1 %v1606_v58 }
  0x16   :  { %1224 = vmatprep.subr.mxu1 %v1421_v51 }
  0x17   :  { %1225 = vmatpush3.msra.mxu1 %v1613_v59 }
  0x18   :  { %217 = vmatpush1.bf16.msra.mxu0 %v1384_v29  ;;  %1226 = vmatprep.subr.mxu1 %v1421_v51 }
  0x19   :  { %218 = vmatprep.subr.bf16.mxu0 %v1419_v3  ;;  %1227 = vmatpush3.msra.mxu1 %v1620_v60 }
  0x1a   :  { %1228 = vmatprep.subr.mxu1 %v1421_v51 }
  0x1b   :  { %1229 = vmatpush3.msra.mxu1 %v1627_v61 }
  0x1c   :  { %219 = vmatpush1.bf16.msra.mxu0 %v1385_v30  ;;  %1230 = vmatprep.subr.mxu1 %v1421_v51 }
  0x1d   :  { %220 = vmatprep.subr.bf16.mxu0 %v1419_v3  ;;  %1231 = vmatpush3.msra.mxu1 %v1634_v62 }
  0x1e   :  { %1232 = vmatprep.subr.mxu1 %v1421_v51 }
  0x1f   :  { %1233 = vmatpush3.msra.mxu1 %v1641_v63 }
  0x20   :  { %221 = vmatpush1.bf16.msra.mxu0 %v1386_v31  ;;  %1234 = vmatprep.subr.mxu1 %v1421_v51 }
  0x21   :  { %230 = vmatprep.subr.bf16.mxu0 %v1419_v3 }
  0x24   :  { %231 = vmatpush2.bf16.msra.mxu0 %v1387_v32 }
  0x25   :  { %232 = vmatprep.subr.bf16.mxu0 %v1419_v3 }
  0x28   :  { %233 = vmatpush2.bf16.msra.mxu0 %v1388_v33 }
  0x29   :  { %234 = vmatprep.subr.bf16.mxu0 %v1419_v3 }
  0x2c   :  { %235 = vmatpush2.bf16.msra.mxu0 %v1389_v34 }
  0x2d   :  { %236 = vmatprep.subr.bf16.mxu0 %v1419_v3  ;;  %v1669_v3 = vld [vmem:[%s1933_s9] sm:$0xff] }
  0x30   :  { %237 = vmatpush2.bf16.msra.mxu0 %v1390_v35 }
  0x76   :  { %v69_v39 = vpop.permute.xlu1 %68 }
  0x77   :  { %v76_v43 = vsel %vm58_vm2, %v1491_v2, %v69_v39  ;;  %v1662_v2 = vld [vmem:[%s1933_s9 + $0x8] sm:$0xff] }
  0x78   :  { %v81_v48 = vrot.slane %v76_v43, 2 }
  0x79   :  { %v1376_v36 = vpop.permute.xlu0 %1375 }
  0x7a   :  { %v1378_v37 = vunpack.i.h.bf16 %v1376_v36  ;;  %v1377_v38 = vunpack.i.l.bf16 %v1376_v36 }
  0x7c   :  { %v75_v40 = vsel %vm58_vm2, %v1486_v1, %v1377_v38  ;;  %v60_v44 = vsel %vm58_vm2, %v1481_v0, %v1378_v37  ;;  %v1647_v0 = vld [vmem:[%s1933_s9 + $0x18] sm:$0xff]  ;;  %v1653_v1 = vld [vmem:[%s1933_s9 + $0x10] sm:$0xff] }
  0x7d   :  { %v79_v41 = vrot.slane %v75_v40, 2  ;;  %v47_v42 = vpop.permute.xlu0 %46  ;;  %1235 = vmatpush3.msra.mxu1 %v1647_v0 }
  0x7e   :  { %v59_v45 = vsel %vm58_vm2, %v1500_v8, %v47_v42  ;;  %1236 = vmatprep.subr.mxu1 %v1421_v51 }
  0x7f   :  { %v91_v46 = vsel %vm52_vm1, %v60_v44, %v79_v41  ;;  %v82_v49 = vsel %vm52_vm1, %v79_v41, %v81_v48  ;;  %1237 = vmatpush3.msra.mxu1 %v1653_v1 }
  0x80   :  { %v93_v47 = vpack.c.bf16 %v91_v46, %v59_v45  ;;  %v95_v50 = vpack.c.bf16 %v81_v48, %v82_v49  ;;  %1238 = vmatprep.subr.mxu1 %v1421_v51 }
  0x81   :  { %1239 = vmatpush3.msra.mxu1 %v1662_v2 }
  0x82   :  { %239 = vmatmul.mubr.bf16.vlgmr.msra.gmra.mxu0 %v93_v47  ;;  %1240 = vmatprep.subr.mxu1 %v1421_v51 }
  0x83   :  { %1078 = vmatprep.mubr.msk.bf16.mxu0 %vm58_vm2, %v96_v26  ;;  %1241 = vmatpush3.msra.mxu1 %v1669_v3 }
  0x84   :  { %1245 = vmatprep.subr.mxu1 %v1421_v51 }
  0x8a   :  { %247 = vmatmul.mubr.bf16.gmra.mxu0 %v95_v50 }
 0x142   :  { %v240_v5 = vpop.f32.mrf.mxu0 }
 0x143   :  { %v241_v7 = vadd.f32 %v1064_v4, %v240_v5 }
 0x144   :  { %v242_v6 = vpop.f32.mrf.mxu0 }
 0x145   :  { %v260_v11 = vrot.slane %v241_v7, 7  ;;  %v256_v17 = vrot.slane %v241_v7, 1  ;;  %v1391_v6 = vld [vmem:[%s1935_s5 + $0x78] sm:$0xff]  }
 0x146   :  { %v243_v8 = vpop.f32.mrf.mxu0  ;;  %v1392_v7 = vld [vmem:[%s1935_s5 + $0xb8] sm:$0xff]   ;;  %1138 = vmatprep.subr.bf16.mxu0 %v1391_v6 }
 0x147   :  { %v244_v9 = vadd.f32 %v1064_v4, %v243_v8  ;;  %v1684_v24 = vsel %vm259_vm4, %v256_v17, %v260_v11  ;;  %v1393_v8 = vld [vmem:[%s1935_s5 + $0x38] sm:$0xff]   ;;  %v1402_v17 = vld [vmem:[%s1935_s5 + $0x20] sm:$0xff]  }
 0x148   :  { %v245_v10 = vpop.f32.mrf.mxu0  ;;  %v292_v41 = vmul.f32 %v1684_v24, %v1684_v24  ;;  %1139 = vmatpush3.bf16.msra.mxu0 %v1393_v8 }
 0x149   :  { %v261_v12 = vrot.slane %v244_v9, 7  ;;  %v265_v13 = vrot.slane %v244_v9, 5  ;;  %v1394_v9 = vld [vmem:[%s1935_s5 + $0x70] sm:$0xff]  }
 0x14a   :  { %v248_v14 = vpop.f32.mrf.mxu0  ;;  %v1395_v10 = vld [vmem:[%s1935_s5 + $0xb0] sm:$0xff]   ;;  %1140 = vmatprep.subr.bf16.mxu0 %v1394_v9 }
 0x14b   :  { %v262_v15 = vsel %vm259_vm4, %v260_v11, %v261_v12  ;;  %v249_v16 = vadd.f32 %v1064_v4, %v248_v14  ;;  %v1396_v11 = vld [vmem:[%s1935_s5 + $0x30] sm:$0xff]   ;;  %v1399_v14 = vld [vmem:[%s1935_s5 + $0x28] sm:$0xff]  }
 0x14c   :  { %v250_v18 = vpop.f32.mrf.mxu0  ;;  %v1680_v20 = vsel %vm42_vm0, %v262_v15, %v265_v13  ;;  %1141 = vmatpush3.bf16.msra.mxu0 %v1396_v11  ;;  %v1400_v15 = vld [vmem:[%s1935_s5 + $0x60] sm:$0xff]  }
 0x14d   :  { %v271_v19 = vrot.slane %v249_v16, 5  ;;  %v283_v27 = vadd.f32 %v1680_v20, %v1684_v24  ;;  %v293_v39 = vmul.f32 %v1680_v20, %v1680_v20  ;;  %v1401_v16 = vld [vmem:[%s1935_s5 + $0xa0] sm:$0xff]   ;;  %v1403_v18 = vld [vmem:[%s1935_s5 + $0x58] sm:$0xff]  }
 0x14e   :  { %v251_v21 = vpop.f32.mrf.mxu0 }
 0x14f   :  { %v272_v22 = vsel %vm270_vm5, %v265_v13, %v271_v19  ;;  %v252_v23 = vadd.f32 %v1064_v4, %v251_v21  ;;  %v296_v43 = vadd.f32 %v293_v39, %v292_v41  ;;  %v1398_v13 = vld [vmem:[%s1935_s5 + $0xa8] sm:$0xff]   ;;  %v1405_v21 = vld [vmem:[%s1935_s5 + $0x18] sm:$0xff]  }
 0x150   :  { %v1687_v25 = vsel %vm259_vm4, %v261_v12, %v272_v22  ;;  %v253_v26 = vpop.f32.mrf.mxu0  ;;  %v1397_v12 = vld [vmem:[%s1935_s5 + $0x68] sm:$0xff]   ;;  %v1406_v22 = vld [vmem:[%s1935_s5 + $0x50] sm:$0xff]  }
 0x151   :  { %v273_v28 = vrot.slane %v252_v23, 5  ;;  %v277_v29 = vrot.slane %v252_v23, 3  ;;  %v284_v30 = vadd.f32 %v283_v27, %v1687_v25  ;;  %v294_v42 = vmul.f32 %v1687_v25, %v1687_v25  ;;  %1142 = vmatprep.subr.bf16.mxu0 %v1397_v12  ;;  %v1407_v23 = vld [vmem:[%s1935_s5 + $0x90] sm:$0xff]   ;;  %v1409_v27 = vld [vmem:[%s1935_s5 + $0x48] sm:$0xff]  }
 0x152   :  { %1143 = vmatpush3.bf16.msra.mxu0 %v1399_v14  ;;  %v1408_v26 = vld [vmem:[%s1935_s5 + $0x10] sm:$0xff]  }
 0x153   :  { %v274_v31 = vsel %vm270_vm5, %v271_v19, %v273_v28  ;;  %v297_v45 = vadd.f32 %v296_v43, %v294_v42  ;;  %1144 = vmatprep.subr.bf16.mxu0 %v1400_v15  ;;  %v1404_v19 = vld [vmem:[%s1935_s5 + $0x98] sm:$0xff]   ;;  %v1410_v28 = vld [vmem:[%s1935_s5 + $0x88] sm:$0xff]   ;;  %v472_v43 = vlaneseq }
 0x154   :  { %v1694_v32 = vsel %vm42_vm0, %v274_v31, %v277_v29  ;;  %v1411_v29 = vld [vmem:[%s1935_s5 + $0x8] sm:$0xff]   ;;  %v1413_v31 = vld [vmem:[%s1935_s5 + $0x80] sm:$0xff]  }
 0x155   :  { %v285_v33 = vadd.f32 %v284_v30, %v1694_v32  ;;  %v295_v44 = vmul.f32 %v1694_v32, %v1694_v32  ;;  %v1412_v30 = vld [vmem:[%s1935_s5 + $0x40] sm:$0xff]  }
 0x156   :  { %1145 = vmatpush3.bf16.msra.mxu0 %v1402_v17 }
 0x157   :  { %v286_v34 = vrot.slane %v285_v33, 4  ;;  %v298_v46 = vadd.f32 %v297_v45, %v295_v44  ;;  %1146 = vmatprep.subr.bf16.mxu0 %v1403_v18  ;;  %v473_v44 = vshrl.u32 %v472_v43, 7  ;;  %v467_v45 = vld [vmem:[%s1936_s3] sm:$0x1] }
 0x159   :  { %v287_v35 = vadd.f32 %v286_v34, %v285_v33  ;;  %v299_v47 = vrot.slane %v298_v46, 4  ;;  %v1414_v33 = vld [vmem:[%s1935_s5] sm:$0xff]  }
 0x15a   :  { %1147 = vmatpush3.bf16.msra.mxu0 %v1405_v21 }
 0x15b   :  { %v288_v36 = vrot.slane %v287_v35, 2  ;;  %v300_v48 = vadd.f32 %v299_v47, %v298_v46  ;;  %1148 = vmatprep.subr.bf16.mxu0 %v1406_v22  ;;  %v1815_v46 = vsub.s32 0, %v473_v44 }
 0x15d   :  { %v289_v37 = vadd.f32 %v288_v36, %v287_v35  ;;  %v301_v49 = vrot.slane %v300_v48, 2 }
 0x15e   :  { %1149 = vmatpush3.bf16.msra.mxu0 %v1408_v26 }
 0x15f   :  { %v290_v38 = vrot.slane %v289_v37, 1  ;;  %v302_v50 = vadd.f32 %v301_v49, %v300_v48  ;;  %1150 = vmatprep.subr.bf16.mxu0 %v1409_v27  ;;  %v469_v49 = vld [vmem:[%s1937_s4] sm:$0x1] }
 0x161   :  { %v291_v40 = vadd.f32 %v290_v38, %v289_v37  ;;  %v303_v4 = vrot.slane %v302_v50, 1 }
 0x162   :  { %1151 = vmatpush3.bf16.msra.mxu0 %v1411_v29 }
 0x163   :  { %1243 = vmatmul.mubr.f32.vlgmr.msra.gmra.mxu1 %v291_v40  ;;  %v304_v5 = vadd.f32 %v303_v4, %v302_v50  ;;  %1152 = vmatprep.subr.bf16.mxu0 %v1412_v30 }
 0x164   :  { %1246 = vmatpush3.msra.mxu1 %v1564_v52  ;;  %1277 = vmatprep.mubr.msk.f32.mxu1 %vm1422_vm3, %v1421_v51 }
 0x165   :  { %1247 = vmatprep.subr.mxu1 %v1421_v51 }
 0x166   :  { %1248 = vmatpush3.msra.mxu1 %v1571_v53  ;;  %1153 = vmatpush3.bf16.msra.mxu0 %v1414_v33 }
 0x167   :  { %1249 = vmatprep.subr.mxu1 %v1421_v51  ;;  %1300 = vmatprep.subr.mxu0 %v1421_v51 }
 0x168   :  { %1250 = vmatpush3.msra.mxu1 %v1578_v54 }
 0x169   :  { %1251 = vmatprep.subr.mxu1 %v1421_v51 }
 0x16a   :  { %1252 = vmatpush3.msra.mxu1 %v1585_v55 }
 0x16b   :  { %1253 = vmatprep.subr.mxu1 %v1421_v51 }
 0x16c   :  { %1254 = vmatpush3.msra.mxu1 %v1592_v56 }
 0x16d   :  { %1255 = vmatprep.subr.mxu1 %v1421_v51 }
 0x16e   :  { %1256 = vmatpush3.msra.mxu1 %v1599_v57 }
 0x16f   :  { %1257 = vmatprep.subr.mxu1 %v1421_v51 }
 0x170   :  { %1258 = vmatpush3.msra.mxu1 %v1606_v58 }
 0x171   :  { %1259 = vmatprep.subr.mxu1 %v1421_v51 }
 0x172   :  { %1260 = vmatpush3.msra.mxu1 %v1613_v59 }
 0x173   :  { %1261 = vmatprep.subr.mxu1 %v1421_v51 }
 0x174   :  { %1262 = vmatpush3.msra.mxu1 %v1620_v60 }
 0x175   :  { %1263 = vmatprep.subr.mxu1 %v1421_v51 }
 0x176   :  { %1264 = vmatpush3.msra.mxu1 %v1627_v61 }
 0x177   :  { %1265 = vmatprep.subr.mxu1 %v1421_v51 }
 0x178   :  { %1266 = vmatpush3.msra.mxu1 %v1634_v62 }
 0x179   :  { %1267 = vmatprep.subr.mxu1 %v1421_v51 }
 0x17a   :  { %1268 = vmatpush3.msra.mxu1 %v1641_v63 }
 0x17b   :  { %1269 = vmatprep.subr.mxu1 %v1421_v51 }
 0x17c   :  { %1270 = vmatpush3.msra.mxu1 %v1647_v0 }
 0x17d   :  { %1271 = vmatprep.subr.mxu1 %v1421_v51 }
 0x17e   :  { %1272 = vmatpush3.msra.mxu1 %v1653_v1 }
 0x17f   :  { %1273 = vmatprep.subr.mxu1 %v1421_v51 }
 0x180   :  { %1274 = vmatpush3.msra.mxu1 %v1662_v2 }
 0x181   :  { %1275 = vmatprep.subr.mxu1 %v1421_v51 }
 0x182   :  { %1276 = vmatpush3.msra.mxu1 %v1669_v3 }
 0x183   :  { %1278 = vmatmul.mubr.f32.vlgmr.msra.gmra.mxu1 %v304_v5  ;;  %1280 = vmatprep.subr.bf16.mxu1 %v1392_v7 }
 0x184   :  { %1281 = vmatpush3.bf16.msra.mxu1 %v1392_v7 }
 0x185   :  { %1282 = vmatprep.subr.bf16.mxu1 %v1395_v10 }
 0x188   :  { %1283 = vmatpush3.bf16.msra.mxu1 %v1395_v10 }
 0x189   :  { %1284 = vmatprep.subr.bf16.mxu1 %v1398_v13 }
 0x18c   :  { %1285 = vmatpush3.bf16.msra.mxu1 %v1398_v13 }
 0x18d   :  { %1286 = vmatprep.subr.bf16.mxu1 %v1401_v16 }
 0x190   :  { %1287 = vmatpush3.bf16.msra.mxu1 %v1401_v16 }
 0x191   :  { %1288 = vmatprep.subr.bf16.mxu1 %v1404_v19 }
 0x194   :  { %1289 = vmatpush3.bf16.msra.mxu1 %v1404_v19 }
 0x195   :  { %1290 = vmatprep.subr.bf16.mxu1 %v1407_v23 }
 0x198   :  { %1291 = vmatpush3.bf16.msra.mxu1 %v1407_v23 }
 0x199   :  { %1292 = vmatprep.subr.bf16.mxu1 %v1410_v28 }
 0x19c   :  { %1293 = vmatpush3.bf16.msra.mxu1 %v1410_v28 }
 0x19d   :  { %1294 = vmatprep.subr.bf16.mxu1 %v1413_v31 }
 0x1a0   :  { %1295 = vmatpush3.bf16.msra.mxu1 %v1413_v31 }
 0x1a1   :  { %1335 = vmatprep.subr.mxu1 %v1421_v51 }
 0x223   :  { %v387_v34 = vpop.f32.mrf.mxu1 }
 0x224   :  { %v391_v36 = vmul.f32 0.001953125, %v387_v34 }
 0x225   :  { %v1244_v35 = vpop.f32.mrf.mxu1 }
 0x226   :  { %v463_v38 = vmul.f32 %v391_v36, %v391_v36 }
 0x243   :  { %v458_v37 = vpop.f32.mrf.mxu1 }
 0x244   :  { %v462_v39 = vmul.f32 0.001953125, %v458_v37 }
 0x245   :  { %v1279_v40 = vpop.f32.mrf.mxu1 }
 0x246   :  { %v464_v41 = vsub.f32 %v462_v39, %v463_v38 }
 0x248   :  { %v465_v42 = vadd.f32 1e-05, %v464_v41 }
 0x24a   :  { %1415 = vrsqrt.f32 %v465_v42 }
 0x257   :  { %v1416_v47 = vpop.eup %1415 }
 0x258   :  { %v468_v48 = vmul.f32 %v1416_v47, %v467_v45 }
 0x25a   :  { %v470_v50 = vmul.f32 %v468_v48, %v391_v36  ;;  %v475_v4 = vrot.slane %v468_v48, %v1815_v46 }
 0x25c   :  { %v471_v5 = vsub.f32 %v469_v49, %v470_v50  ;;  %v476_v6 = vmul.f32 %v475_v4, %v1684_v24  ;;  %v477_v7 = vmul.f32 %v475_v4, %v1680_v20  ;;  %v478_v8 = vmul.f32 %v475_v4, %v1687_v25 }
 0x25d   :  { %v479_v9 = vmul.f32 %v475_v4, %v1694_v32 }
 0x25e   :  { %v484_v10 = vrot.slane %v471_v5, %v1815_v46 }
 0x260   :  { %v486_v11 = vadd.f32 %v484_v10, %v476_v6  ;;  %v487_v12 = vadd.f32 %v484_v10, %v477_v7  ;;  %v488_v13 = vadd.f32 %v484_v10, %v478_v8  ;;  %v489_v14 = vadd.f32 %v484_v10, %v479_v9 }
 0x262   :  { %v490_v15 = vmax.f32 %v486_v11, 0.0  ;;  %v491_v16 = vmax.f32 %v487_v12, 0.0  ;;  %v492_v17 = vmax.f32 %v488_v13, 0.0  ;;  %v493_v18 = vmax.f32 %v489_v14, 0.0 }
 0x264   :  { %v508_v19 = vrot.slane %v492_v17, 1  ;;  %v509_v21 = vrot.slane %v493_v18, 1  ;;  %v496_v22 = vrot.slane %v490_v15, 1  ;;  %v497_v24 = vrot.slane %v491_v16, 1 }
 0x265   :  { %v511_v23 = vrot.slane %v492_v17, 2  ;;  %v512_v20 = vrot.slane %v493_v18, 2  ;;  %v501_v26 = vrot.slane %v490_v15, 2  ;;  %v502_v32 = vrot.slane %v491_v16, 2 }
 0x266   :  { %v510_v25 = vsel %vm42_vm0, %v508_v19, %v509_v21  ;;  %v516_v27 = vrot.slane %v509_v21, 2  ;;  %v498_v34 = vsel %vm42_vm0, %v496_v22, %v497_v24 }
 0x267   :  { %v514_v28 = vrot.slane %v510_v25, 2  ;;  %v513_v29 = vsel %vm52_vm1, %v511_v23, %v512_v20  ;;  %v529_v31 = vsel %vm52_vm1, %v491_v16, %v511_v23  ;;  %v518_v33 = vrot.slane %v512_v20, 2 }
 0x268   :  { %v515_v30 = vrot.slane %v513_v29, 2  ;;  %v503_v38 = vsel %vm52_vm1, %v501_v26, %v502_v32  ;;  %v532_v42 = vpack.c.bf16 %v529_v31, %v490_v15  ;;  %v535_v45 = vpack.c.bf16 %v512_v20, %v513_v29 }
 0x269   :  { %v530_v35 = vsel %vm52_vm1, %v497_v24, %v514_v28  ;;  %v517_v36 = vsel %vm52_vm1, %v514_v28, %v516_v27 }
 0x26a   :  { %v533_v37 = vpack.c.bf16 %v530_v35, %v498_v34  ;;  %v531_v39 = vsel %vm52_vm1, %v502_v32, %v515_v30  ;;  %v519_v40 = vsel %vm52_vm1, %v515_v30, %v518_v33  ;;  %v536_v44 = vpack.c.bf16 %v516_v27, %v517_v36 }
 0x26b   :  { %v534_v41 = vpack.c.bf16 %v531_v39, %v503_v38  ;;  %v537_v43 = vpack.c.bf16 %v518_v33, %v519_v40 }
 0x26c   :  { %769 = vmatprep.mubr.bf16.mxu0 %v533_v37 }
 0x26d   :  { %1296 = vmatprep.mubr.bf16.mxu1 %v534_v41  ;;  %770 = vmatmul.mubr.bf16.vlgmr.msra.gmra.mxu0 %v532_v42 }
 0x26e   :  { %1297 = vmatmul.mubr.bf16.vlgmr.msra.gmra.mxu1 %v537_v43  ;;  %777 = vmatprep.mubr.bf16.mxu0 %v536_v44 }
 0x26f   :  { %1301 = vmatpush3.msra.mxu0 %v1564_v52  ;;  %1336 = vmatpush3.msra.mxu1 %v1564_v52 }
 0x270   :  { %1302 = vmatprep.subr.mxu0 %v1421_v51  ;;  %1337 = vmatprep.subr.mxu1 %v1421_v51 }
 0x271   :  { %1303 = vmatpush3.msra.mxu0 %v1571_v53  ;;  %1338 = vmatpush3.msra.mxu1 %v1571_v53 }
 0x272   :  { %1304 = vmatprep.subr.mxu0 %v1421_v51  ;;  %1339 = vmatprep.subr.mxu1 %v1421_v51 }
 0x273   :  { %1305 = vmatpush3.msra.mxu0 %v1578_v54  ;;  %1340 = vmatpush3.msra.mxu1 %v1578_v54 }
 0x274   :  { %1306 = vmatprep.subr.mxu0 %v1421_v51  ;;  %1341 = vmatprep.subr.mxu1 %v1421_v51 }
 0x275   :  { %778 = vmatmul.mubr.bf16.gmra.mxu0 %v535_v45  ;;  %1342 = vmatpush3.msra.mxu1 %v1585_v55 }
 0x276   :  { %1307 = vmatpush3.msra.mxu0 %v1585_v55  ;;  %1343 = vmatprep.subr.mxu1 %v1421_v51  ;;  %v1079_v55 = vld [vmem:[%s1938_s6] ss:$0 sm:$0xff] }
 0x277   :  { %1308 = vmatprep.subr.mxu0 %v1421_v51  ;;  %1344 = vmatpush3.msra.mxu1 %v1592_v56 }
 0x278   :  { %1309 = vmatpush3.msra.mxu0 %v1592_v56  ;;  %1345 = vmatprep.subr.mxu1 %v1421_v51 }
 0x279   :  { %1310 = vmatprep.subr.mxu0 %v1421_v51  ;;  %1346 = vmatpush3.msra.mxu1 %v1599_v57 }
 0x27a   :  { %1311 = vmatpush3.msra.mxu0 %v1599_v57  ;;  %1347 = vmatprep.subr.mxu1 %v1421_v51 }
 0x27b   :  { %1312 = vmatprep.subr.mxu0 %v1421_v51  ;;  %1348 = vmatpush3.msra.mxu1 %v1606_v58 }
 0x27c   :  { %1313 = vmatpush3.msra.mxu0 %v1606_v58  ;;  %1349 = vmatprep.subr.mxu1 %v1421_v51 }
 0x27d   :  { %1314 = vmatprep.subr.mxu0 %v1421_v51  ;;  %1350 = vmatpush3.msra.mxu1 %v1613_v59 }
 0x27e   :  { %1315 = vmatpush3.msra.mxu0 %v1613_v59  ;;  %1351 = vmatprep.subr.mxu1 %v1421_v51 }
 0x27f   :  { %1316 = vmatprep.subr.mxu0 %v1421_v51  ;;  %1352 = vmatpush3.msra.mxu1 %v1620_v60 }
 0x280   :  { %1317 = vmatpush3.msra.mxu0 %v1620_v60  ;;  %1353 = vmatprep.subr.mxu1 %v1421_v51 }
 0x281   :  { %1318 = vmatprep.subr.mxu0 %v1421_v51  ;;  %1354 = vmatpush3.msra.mxu1 %v1627_v61 }
 0x282   :  { %1319 = vmatpush3.msra.mxu0 %v1627_v61  ;;  %1355 = vmatprep.subr.mxu1 %v1421_v51 }
 0x283   :  { %1320 = vmatprep.subr.mxu0 %v1421_v51  ;;  %1356 = vmatpush3.msra.mxu1 %v1634_v62 }
 0x284   :  { %1321 = vmatpush3.msra.mxu0 %v1634_v62  ;;  %1357 = vmatprep.subr.mxu1 %v1421_v51 }
 0x285   :  { %1322 = vmatprep.subr.mxu0 %v1421_v51  ;;  %1358 = vmatpush3.msra.mxu1 %v1641_v63 }
 0x286   :  { %1323 = vmatpush3.msra.mxu0 %v1641_v63  ;;  %1359 = vmatprep.subr.mxu1 %v1421_v51 }
 0x287   :  { %1324 = vmatprep.subr.mxu0 %v1421_v51  ;;  %1360 = vmatpush3.msra.mxu1 %v1647_v0 }
 0x288   :  { %1325 = vmatpush3.msra.mxu0 %v1647_v0  ;;  %1361 = vmatprep.subr.mxu1 %v1421_v51 }
 0x289   :  { %1326 = vmatprep.subr.mxu0 %v1421_v51  ;;  %1362 = vmatpush3.msra.mxu1 %v1653_v1 }
 0x28a   :  { %1327 = vmatpush3.msra.mxu0 %v1653_v1  ;;  %1363 = vmatprep.subr.mxu1 %v1421_v51 }
 0x28b   :  { %1328 = vmatprep.subr.mxu0 %v1421_v51  ;;  %1332 = vmatprep.mubr.msk.f32.mxu0 %vm1422_vm3, %v1421_v51 }
 0x28c   :  { %1329 = vmatpush3.msra.mxu0 %v1662_v2  ;;  %1364 = vmatpush3.msra.mxu1 %v1662_v2 }
 0x28d   :  { %1330 = vmatprep.subr.mxu0 %v1421_v51  ;;  %1365 = vmatprep.subr.mxu1 %v1421_v51 }
 0x28e   :  { %1331 = vmatpush3.msra.mxu0 %v1669_v3  ;;  %1366 = vmatpush3.msra.mxu1 %v1669_v3 }
 0x28f   :  { %1367 = vmatprep.mubr.msk.f32.mxu1 %vm1422_vm3, %v1421_v51 }
 0x32d   :  { %v1154_v52 = vpop.f32.mrf.mxu0 }
 0x32e   :  { %v1298_v53 = vpop.f32.mrf.mxu1 }
 0x32f   :  { %v1155_v54 = vpop.f32.mrf.mxu0 }
 0x330   :  { %v1156_v56 = vadd.f32 %v1155_v54, %v1154_v52  ;;  %v820_v57 = vpop.f32.mrf.mxu1 }
 0x331   :  { %v1157_v58 = vpop.f32.mrf.mxu0 }
 0x332   :  { %v772_v59 = vadd.f32 %v1156_v56, %v1079_v55  ;;  %v1299_v60 = vpop.f32.mrf.mxu1 }
 0x333   :  { %v1158_v61 = vpop.f32.mrf.mxu0 }
 0x334   :  { %v1159_v62 = vadd.f32 %v1158_v61, %v1157_v58  ;;  %v821_v63 = vadd.f32 %v820_v57, %v772_v59  ;;  %v823_v2 = vpop.f32.mrf.mxu1  ;;  %v1029_v59 = vld [vmem:[%s1939_s7] sm:$0x1] }
 0x335   :  { %v1160_v0 = vpop.f32.mrf.mxu0 }
 0x336   :  { %v775_v1 = vadd.f32 %v1159_v62, %v1079_v55  ;;  %v836_v48 = vrot.slane %v821_v63, 1  ;;  %v839_v50 = vrot.slane %v821_v63, 7  ;;  %v1031_v62 = vld [vmem:[%s1940_s8] sm:$0x1] }
 0x337   :  { %v1161_v3 = vpop.f32.mrf.mxu0 }
 0x338   :  { %v824_v51 = vadd.f32 %v823_v2, %v775_v1  ;;  %v1162_v47 = vadd.f32 %v1161_v3, %v1160_v0  ;;  %v857_v12 = vsel %vm259_vm4, %v836_v48, %v839_v50 }
 0x339   :  { %v1163_v49 = vpop.f32.mrf.mxu0  ;;  %v870_v18 = vmul.f32 %v857_v12, %v857_v12 }
 0x33a   :  { %v840_v4 = vrot.slane %v824_v51, 7  ;;  %v844_v5 = vrot.slane %v824_v51, 5  ;;  %v780_v6 = vadd.f32 %v1162_v47, %v1079_v55 }
 0x33b   :  { %v1164_v7 = vpop.f32.mrf.mxu0 }
 0x33c   :  { %v841_v8 = vsel %vm259_vm4, %v839_v50, %v840_v4  ;;  %v829_v9 = vadd.f32 %v1298_v53, %v780_v6  ;;  %v1165_v10 = vadd.f32 %v1164_v7, %v1163_v49 }
 0x33d   :  { %v858_v11 = vsel %vm42_vm0, %v841_v8, %v844_v5 }
 0x33e   :  { %v849_v13 = vrot.slane %v829_v9, 5  ;;  %v783_v14 = vadd.f32 %v1165_v10, %v1079_v55  ;;  %v871_v15 = vmul.f32 %v858_v11, %v858_v11  ;;  %v861_v21 = vadd.f32 %v858_v11, %v857_v12 }
 0x340   :  { %v850_v16 = vsel %vm270_vm5, %v844_v5, %v849_v13  ;;  %v832_v17 = vadd.f32 %v1299_v60, %v783_v14  ;;  %v874_v20 = vadd.f32 %v871_v15, %v870_v18 }
 0x341   :  { %v859_v19 = vsel %vm259_vm4, %v840_v4, %v850_v16 }
 0x342   :  { %v872_v22 = vmul.f32 %v859_v19, %v859_v19  ;;  %v851_v24 = vrot.slane %v832_v17, 5  ;;  %v855_v23 = vrot.slane %v832_v17, 3  ;;  %v862_v25 = vadd.f32 %v861_v21, %v859_v19 }
 0x344   :  { %v852_v26 = vsel %vm270_vm5, %v849_v13, %v851_v24  ;;  %v875_v29 = vadd.f32 %v874_v20, %v872_v22 }
 0x345   :  { %v860_v32 = vsel %vm42_vm0, %v852_v26, %v855_v23 }
 0x346   :  { %v863_v27 = vadd.f32 %v862_v25, %v860_v32  ;;  %v873_v28 = vmul.f32 %v860_v32, %v860_v32 }
 0x348   :  { %v864_v30 = vrot.slane %v863_v27, 4  ;;  %v876_v31 = vadd.f32 %v875_v29, %v873_v28 }
 0x34a   :  { %v865_v33 = vadd.f32 %v864_v30, %v863_v27  ;;  %v877_v34 = vrot.slane %v876_v31, 4 }
 0x34c   :  { %v866_v35 = vrot.slane %v865_v33, 2  ;;  %v878_v36 = vadd.f32 %v877_v34, %v876_v31 }
 0x34e   :  { %v867_v37 = vadd.f32 %v866_v35, %v865_v33  ;;  %v879_v38 = vrot.slane %v878_v36, 2 }
 0x350   :  { %v868_v39 = vrot.slane %v867_v37, 1  ;;  %v880_v40 = vadd.f32 %v879_v38, %v878_v36 }
 0x352   :  { %v869_v41 = vadd.f32 %v868_v39, %v867_v37  ;;  %v881_v42 = vrot.slane %v880_v40, 1 }
 0x354   :  { %1333 = vmatmul.mubr.f32.vlgmr.msra.gmra.mxu0 %v869_v41  ;;  %v882_v43 = vadd.f32 %v881_v42, %v880_v40 }
 0x356   :  { %1368 = vmatmul.mubr.f32.vlgmr.msra.gmra.mxu1 %v882_v43 }
 0x414   :  { %v949_v44 = vpop.f32.mrf.mxu0 }
 0x415   :  { %v953_v45 = vmul.f32 0.001953125, %v949_v44 }
 0x416   :  { %v1334_v52 = vpop.f32.mrf.mxu0  ;;  %v1020_v53 = vpop.f32.mrf.mxu1 }
 0x417   :  { %v1025_v54 = vmul.f32 %v953_v45, %v953_v45  ;;  %v1024_v55 = vmul.f32 0.001953125, %v1020_v53 }
 0x418   :  { %v1369_v56 = vpop.f32.mrf.mxu1 }
 0x419   :  { %v1026_v57 = vsub.f32 %v1024_v55, %v1025_v54 }
 0x41b   :  { %v1027_v58 = vadd.f32 1e-05, %v1026_v57 }
 0x41d   :  { %1417 = vrsqrt.f32 %v1027_v58 }
 0x42a   :  { %v1418_v60 = vpop.eup %1417 }
 0x42b   :  { %v1030_v61 = vmul.f32 %v1418_v60, %v1029_v59 }
 0x42d   :  { %v1032_v63 = vmul.f32 %v1030_v61, %v953_v45  ;;  %v1037_v0 = vrot.slane %v1030_v61, %v1815_v46 }
 0x42f   :  { %v1033_v1 = vsub.f32 %v1031_v62, %v1032_v63  ;;  %v1038_v2 = vmul.f32 %v1037_v0, %v857_v12  ;;  %v1039_v3 = vmul.f32 %v1037_v0, %v858_v11  ;;  %v1040_v51 = vmul.f32 %v1037_v0, %v859_v19 }
 0x430   :  { %v1041_v47 = vmul.f32 %v1037_v0, %v860_v32 }
 0x431   :  { %v1046_v48 = vrot.slane %v1033_v1, %v1815_v46 }
 0x433   :  { %v1048_v49 = vadd.f32 %v1046_v48, %v1038_v2  ;;  %v1049_v50 = vadd.f32 %v1046_v48, %v1039_v3  ;;  %v1050_v4 = vadd.f32 %v1046_v48, %v1040_v51  ;;  %v1051_v5 = vadd.f32 %v1046_v48, %v1041_v47 }
 0x435   :  { %v1052_v6 = vmax.f32 %v1048_v49, 0.0  ;;  %v1053_v7 = vmax.f32 %v1049_v50, 0.0  ;;  %v1054_v8 = vmax.f32 %v1050_v4, 0.0  ;;  %v1055_v9 = vmax.f32 %v1051_v5, 0.0 }
 0x437   :  { %1056 = vst [vmem:[%s1941_s10] sm:$0xff] %v1052_v6  ;;  %1057 = vst [vmem:[%s1941_s10 + $0x8] sm:$0xff] %v1053_v7 }
 0x438   :  { %1058 = vst [vmem:[%s1941_s10 + $0x10] sm:$0xff] %v1054_v8  ;;  %1059 = vst [vmem:[%s1941_s10 + $0x18] sm:$0xff] %v1055_v9 }

</bundles_post_ra>
